<compile_context>
chip_gen: v5e
topology: v5e:2x2
jax: 0.10.0
libtpu: 0.0.40
codegen_flags: <defaults>
</compile_context>

<pallas_src>
import functools

import jax
import jax.numpy as jnp
from jax.experimental import pallas as pl
from jax.experimental.pallas import tpu as pltpu

IGNORE_LABEL = -1


def _ce_tile_kernel(score_ref, tgt_ref, sum_ref, cnt_ref, *,
                    hw, tile_px, ignore_label):
    """One (C, TILE_PX) block of logits; accumulates per-lane loss / count."""
    t_idx = pl.program_id(1)

    @pl.when(t_idx == 0)
    def _():
        sum_ref[...] = jnp.zeros_like(sum_ref)
        cnt_ref[...] = jnp.zeros_like(cnt_ref)

    x = score_ref[...].astype(jnp.float32)            # (C, TILE_PX)
    labels = tgt_ref[...]                              # (1, TILE_PX) int32

    # numerically stable log-sum-exp over the class (sublane) axis
    m = jnp.max(x, axis=0, keepdims=True)              # (1, TILE_PX)
    lse = jnp.log(jnp.sum(jnp.exp(x - m), axis=0, keepdims=True)) + m

    # target logit via one-hot select (streaming select/add over small C)
    cls = jax.lax.broadcasted_iota(jnp.int32, x.shape, 0)
    tgt_logit = jnp.sum(jnp.where(cls == labels, x, 0.0), axis=0, keepdims=True)

    # mask: ignore_index pixels + out-of-bounds lanes of the ragged last tile
    px = jax.lax.broadcasted_iota(jnp.int32, labels.shape, 1)
    in_bounds = px < (hw - t_idx * tile_px)
    valid = jnp.logical_and(labels != ignore_label, in_bounds)

    loss = lse - tgt_logit                              # (1, TILE_PX)
    sum_ref[...] += jnp.where(valid, loss, 0.0)
    cnt_ref[...] += jnp.where(valid, 1.0, 0.0)


@functools.partial(jax.jit, static_argnames=("ignore_label", "tile_px"))
def cross_entropy_loss(score, target, ignore_label=IGNORE_LABEL, tile_px=None):
    """score: (N, C, H', W') float; target: (N, H, W) int. Returns scalar mean loss."""
    n, c, ph, pw = score.shape
    _, h, w = target.shape
    if (ph, pw) != (h, w):
        # TODO(synk): fuse the bilinear upsample into the kernel (4-tap blend on
        # low-res tiles via scalar-prefetched row indices) instead of
        # materializing the full-resolution tensor in HBM.
        score = jax.image.resize(score, (n, c, h, w), method="bilinear")

    hw = h * w
    itemsize = jnp.dtype(score.dtype).itemsize

    if tile_px is None:
        # target ~2 MiB lane-dense score blocks: comfortably inside the default
        # scoped VMEM on every generation (incl. v7x) once double-buffered.
        tile_px = max(128, ((2 * 1024 * 1024) // (c * itemsize) // 128) * 128)
    if hw <= tile_px:
        tile_px = hw                       # full extent: no 128-divisibility need
    else:
        tile_px = max(128, (tile_px // 128) * 128)
    num_tiles = pl.cdiv(hw, tile_px)

    # contiguous reshapes only: no extra HBM passes, no transpose, no pad.
    logits = score.reshape(n, c, hw)
    labels = target.reshape(n, 1, hw).astype(jnp.int32)

    # TODO(synk): for very large C (classification heads), split C over a second
    # "arbitrary" grid axis with an online logsumexp to bound VMEM per tile.
    kernel = functools.partial(_ce_tile_kernel, hw=hw, tile_px=tile_px,
                               ignore_label=ignore_label)

    part_sum, part_cnt = pl.pallas_call(
        kernel,
        out_shape=(jax.ShapeDtypeStruct((n, 1, tile_px), jnp.float32),
                   jax.ShapeDtypeStruct((n, 1, tile_px), jnp.float32)),
        grid=(n, num_tiles),
        in_specs=[
            pl.BlockSpec((None, c, tile_px), lambda i, t: (i, 0, t)),
            pl.BlockSpec((None, 1, tile_px), lambda i, t: (i, 0, t)),
        ],
        out_specs=(
            pl.BlockSpec((None, 1, tile_px), lambda i, t: (i, 0, 0)),
            pl.BlockSpec((None, 1, tile_px), lambda i, t: (i, 0, 0)),
        ),
        compiler_params=pltpu.CompilerParams(
            dimension_semantics=("parallel", "arbitrary")),
    )(logits, labels)

    # tiny final reduction; reduction='mean' divides by # of non-ignored pixels
    # (NaN if every pixel is ignored, matching PyTorch).
    return jnp.sum(part_sum) / jnp.sum(part_cnt)


def _reference_loss(score, target, ignore_label=IGNORE_LABEL):
    """Pure-JAX reference matching nn.CrossEntropyLoss(ignore_index=-1, 'mean')."""
    n, c, ph, pw = score.shape
    _, h, w = target.shape
    if (ph, pw) != (h, w):
        score = jax.image.resize(score, (n, c, h, w), method="bilinear")
    logits = jnp.transpose(score, (0, 2, 3, 1)).reshape(-1, c).astype(jnp.float32)
    labels = target.reshape(-1).astype(jnp.int32)
    logz = jax.nn.logsumexp(logits, axis=-1)
    tgt = jnp.take_along_axis(
        logits, jnp.clip(labels, 0, c - 1)[:, None], axis=-1)[:, 0]
    valid = (labels != ignore_label).astype(jnp.float32)
    return jnp.sum((logz - tgt) * valid) / jnp.sum(valid)


def _make_inputs(key, n, c, ph, pw, h, w):
    k1, k2, k3 = jax.random.split(key, 3)
    score = jax.random.normal(k1, (n, c, ph, pw), dtype=jnp.float32)
    target = jax.random.randint(k2, (n, h, w), 0, c, dtype=jnp.int32)
    ignore_mask = jax.random.uniform(k3, (n, h, w)) < 0.1
    target = jnp.where(ignore_mask, IGNORE_LABEL, target)
    return score, target


if __name__ == "__main__":
    key = jax.random.PRNGKey(0)
    k_a, k_b, k_c = jax.random.split(key, 3)

    # 1) same resolution (no resize path)
    score, target = _make_inputs(k_a, 2, 4, 16, 16, 16, 16)
    loss = cross_entropy_loss(score, target)
    jax.block_until_ready(loss)
    ref = _reference_loss(score, target)
    assert jnp.allclose(loss, ref, rtol=1e-5, atol=1e-5), (loss, ref)

    # 2) low-res logits -> bilinear upsample glue
    score2, target2 = _make_inputs(k_b, 2, 4, 8, 8, 16, 16)
    loss2 = cross_entropy_loss(score2, target2)
    jax.block_until_ready(loss2)
    ref2 = _reference_loss(score2, target2)
    assert jnp.allclose(loss2, ref2, rtol=1e-5, atol=1e-5), (loss2, ref2)

    # 3) multi-tile + ragged last tile (in-kernel masking path)
    score3, target3 = _make_inputs(k_c, 2, 4, 18, 18, 18, 18)
    loss3 = cross_entropy_loss(score3, target3, tile_px=128)
    jax.block_until_ready(loss3)
    ref3 = _reference_loss(score3, target3)
    assert jnp.allclose(loss3, ref3, rtol=1e-5, atol=1e-5), (loss3, ref3)

    print("KERNEL_OK")
</pallas_src>

<mosaic_0001>
module attributes {stable_mosaic.version = 11 : i64} {
  func.func @_ce_tile_kernel(%arg0: i32, %arg1: i32, %arg2: memref<1x4x256xf32, #tpu.memory_space<vmem>>, %arg3: memref<1x1x256xi32, #tpu.memory_space<vmem>>, %arg4: memref<1x1x256xf32, #tpu.memory_space<vmem>>, %arg5: memref<1x1x256xf32, #tpu.memory_space<vmem>>) attributes {dimension_semantics = [#tpu.dimension_semantics<parallel>, #tpu.dimension_semantics<arbitrary>], iteration_bounds = array<i64: 2, 1>, scalar_prefetch = 0 : i64, scratch_operands = 0 : i64, tpu.core_type = #tpu.core_type<tc>, window_params = [{transform_indices = @transform_0, window_bounds = array<i64: 1, 4, 256>}, {transform_indices = @transform_1, window_bounds = array<i64: 1, 1, 256>}, {transform_indices = @transform_2, window_bounds = array<i64: 1, 1, 256>}, {transform_indices = @transform_3, window_bounds = array<i64: 1, 1, 256>}]} {
    %c0_i32 = arith.constant 0 : i32
    %0 = arith.cmpi eq, %arg1, %c0_i32 : i32
    %1 = arith.extui %0 : i1 to i32
    %c0_i32_0 = arith.constant 0 : i32
    %2 = arith.cmpi ne, %1, %c0_i32_0 : i32
    scf.if %2 {
      %cst_25 = arith.constant 0.000000e+00 : f32
      %49 = vector.broadcast %cst_25 : f32 to vector<1x256xf32>
      %c0_26 = arith.constant 0 : index
      %c0_27 = arith.constant 0 : index
      %c0_28 = arith.constant 0 : index
      %50 = vector.load %arg4[%c0_26, %c0_27, %c0_28] : memref<1x1x256xf32, #tpu.memory_space<vmem>>, vector<1x1x256xf32>
      %51 = vector.shape_cast %50 : vector<1x1x256xf32> to vector<1x256xf32>
      %52 = vector.shape_cast %49 : vector<1x256xf32> to vector<1x1x256xf32>
      tpu.vector_store %arg4[%c0_26, %c0_27, %c0_28], %52 {strides = array<i32>} : memref<1x1x256xf32, #tpu.memory_space<vmem>>, vector<1x1x256xf32>,
      %cst_29 = arith.constant 0.000000e+00 : f32
      %53 = vector.broadcast %cst_29 : f32 to vector<1x256xf32>
      %c0_30 = arith.constant 0 : index
      %c0_31 = arith.constant 0 : index
      %c0_32 = arith.constant 0 : index
      %54 = vector.load %arg5[%c0_30, %c0_31, %c0_32] : memref<1x1x256xf32, #tpu.memory_space<vmem>>, vector<1x1x256xf32>
      %55 = vector.shape_cast %54 : vector<1x1x256xf32> to vector<1x256xf32>
      %56 = vector.shape_cast %53 : vector<1x256xf32> to vector<1x1x256xf32>
      tpu.vector_store %arg5[%c0_30, %c0_31, %c0_32], %56 {strides = array<i32>} : memref<1x1x256xf32, #tpu.memory_space<vmem>>, vector<1x1x256xf32>,
    } else {
    }
    %c0 = arith.constant 0 : index
    %c0_1 = arith.constant 0 : index
    %c0_2 = arith.constant 0 : index
    %3 = vector.load %arg2[%c0, %c0_1, %c0_2] : memref<1x4x256xf32, #tpu.memory_space<vmem>>, vector<1x4x256xf32>
    %4 = vector.shape_cast %3 : vector<1x4x256xf32> to vector<4x256xf32>
    %c0_3 = arith.constant 0 : index
    %c0_4 = arith.constant 0 : index
    %c0_5 = arith.constant 0 : index
    %5 = vector.load %arg3[%c0_3, %c0_4, %c0_5] : memref<1x1x256xi32, #tpu.memory_space<vmem>>, vector<1x1x256xi32>
    %6 = vector.shape_cast %5 : vector<1x1x256xi32> to vector<1x256xi32>
    %cst = arith.constant dense<0xFF800000> : vector<256xf32>
    %7 = vector.multi_reduction <maximumf>, %4, %cst [0] : vector<4x256xf32> to vector<256xf32>
    %8 = vector.shape_cast %7 : vector<256xf32> to vector<1x256xf32>
    %9 = vector.broadcast %8 : vector<1x256xf32> to vector<4x256xf32>
    %10 = arith.subf %4, %9 : vector<4x256xf32>
    %11 = math.exp %10 : vector<4x256xf32>
    %cst_6 = arith.constant dense<0.000000e+00> : vector<256xf32>
    %12 = vector.multi_reduction <add>, %11, %cst_6 [0] : vector<4x256xf32> to vector<256xf32>
    %13 = vector.shape_cast %12 : vector<256xf32> to vector<1x256xf32>
    %14 = math.log %13 : vector<1x256xf32>
    %15 = arith.addf %14, %8 : vector<1x256xf32>
    %16 = tpu.iota {dimensions = array<i32: 0>} : vector<4x256xi32>
    %17 = vector.broadcast %6 : vector<1x256xi32> to vector<4x256xi32>
    %18 = arith.cmpi eq, %16, %17 : vector<4x256xi32>
    %cst_7 = arith.constant 0.000000e+00 : f32
    %19 = vector.broadcast %cst_7 : f32 to vector<4x256xf32>
    %20 = arith.select %18, %4, %19 : vector<4x256xi1>, vector<4x256xf32>
    %cst_8 = arith.constant dense<0.000000e+00> : vector<256xf32>
    %21 = vector.multi_reduction <add>, %20, %cst_8 [0] : vector<4x256xf32> to vector<256xf32>
    %22 = vector.shape_cast %21 : vector<256xf32> to vector<1x256xf32>
    %23 = tpu.iota {dimensions = array<i32: 1>} : vector<1x256xi32>
    %c256_i32 = arith.constant 256 : i32
    %24 = arith.muli %arg1, %c256_i32 : i32
    %c256_i32_9 = arith.constant 256 : i32
    %25 = arith.subi %c256_i32_9, %24 : i32
    %26 = vector.broadcast %25 : i32 to vector<1x256xi32>
    %27 = arith.cmpi slt, %23, %26 : vector<1x256xi32>
    %c-1_i32 = arith.constant -1 : i32
    %28 = vector.broadcast %c-1_i32 : i32 to vector<1x256xi32>
    %29 = arith.cmpi ne, %6, %28 : vector<1x256xi32>
    %30 = arith.andi %29, %27 : vector<1x256xi1>
    %31 = arith.subf %15, %22 : vector<1x256xf32>
    %c0_10 = arith.constant 0 : index
    %c0_11 = arith.constant 0 : index
    %c0_12 = arith.constant 0 : index
    %32 = vector.load %arg4[%c0_10, %c0_11, %c0_12] : memref<1x1x256xf32, #tpu.memory_space<vmem>>, vector<1x1x256xf32>
    %33 = vector.shape_cast %32 : vector<1x1x256xf32> to vector<1x256xf32>
    %cst_13 = arith.constant 0.000000e+00 : f32
    %34 = vector.broadcast %cst_13 : f32 to vector<1x256xf32>
    %35 = arith.select %30, %31, %34 : vector<1x256xi1>, vector<1x256xf32>
    %36 = arith.addf %33, %35 : vector<1x256xf32>
    %c0_14 = arith.constant 0 : index
    %c0_15 = arith.constant 0 : index
    %c0_16 = arith.constant 0 : index
    %37 = vector.load %arg4[%c0_14, %c0_15, %c0_16] : memref<1x1x256xf32, #tpu.memory_space<vmem>>, vector<1x1x256xf32>
    %38 = vector.shape_cast %37 : vector<1x1x256xf32> to vector<1x256xf32>
    %39 = vector.shape_cast %36 : vector<1x256xf32> to vector<1x1x256xf32>
    tpu.vector_store %arg4[%c0_14, %c0_15, %c0_16], %39 {strides = array<i32>} : memref<1x1x256xf32, #tpu.memory_space<vmem>>, vector<1x1x256xf32>,
    %c0_17 = arith.constant 0 : index
    %c0_18 = arith.constant 0 : index
    %c0_19 = arith.constant 0 : index
    %40 = vector.load %arg5[%c0_17, %c0_18, %c0_19] : memref<1x1x256xf32, #tpu.memory_space<vmem>>, vector<1x1x256xf32>
    %41 = vector.shape_cast %40 : vector<1x1x256xf32> to vector<1x256xf32>
    %cst_20 = arith.constant 1.000000e+00 : f32
    %cst_21 = arith.constant 0.000000e+00 : f32
    %42 = vector.broadcast %cst_20 : f32 to vector<1x256xf32>
    %43 = vector.broadcast %cst_21 : f32 to vector<1x256xf32>
    %44 = arith.select %30, %42, %43 : vector<1x256xi1>, vector<1x256xf32>
    %45 = arith.addf %41, %44 : vector<1x256xf32>
    %c0_22 = arith.constant 0 : index
    %c0_23 = arith.constant 0 : index
    %c0_24 = arith.constant 0 : index
    %46 = vector.load %arg5[%c0_22, %c0_23, %c0_24] : memref<1x1x256xf32, #tpu.memory_space<vmem>>, vector<1x1x256xf32>
    %47 = vector.shape_cast %46 : vector<1x1x256xf32> to vector<1x256xf32>
    %48 = vector.shape_cast %45 : vector<1x256xf32> to vector<1x1x256xf32>
    tpu.vector_store %arg5[%c0_22, %c0_23, %c0_24], %48 {strides = array<i32>} : memref<1x1x256xf32, #tpu.memory_space<vmem>>, vector<1x1x256xf32>,
    return
  }
  func.func @transform_0(%arg0: i32, %arg1: i32) -> (i32, i32, i32) {
    %c0_i32 = arith.constant 0 : i32
    %c0_i32_0 = arith.constant 0 : i32
    return %arg0, %c0_i32, %arg1 : i32, i32, i32
  }
  func.func @transform_1(%arg0: i32, %arg1: i32) -> (i32, i32, i32) {
    %c0_i32 = arith.constant 0 : i32
    %c0_i32_0 = arith.constant 0 : i32
    return %arg0, %c0_i32, %arg1 : i32, i32, i32
  }
  func.func @transform_2(%arg0: i32, %arg1: i32) -> (i32, i32, i32) {
    %c0_i32 = arith.constant 0 : i32
    %c0_i32_0 = arith.constant 0 : i32
    %c0_i32_1 = arith.constant 0 : i32
    return %arg0, %c0_i32, %c0_i32_0 : i32, i32, i32
  }
  func.func @transform_3(%arg0: i32, %arg1: i32) -> (i32, i32, i32) {
    %c0_i32 = arith.constant 0 : i32
    %c0_i32_0 = arith.constant 0 : i32
    %c0_i32_1 = arith.constant 0 : i32
    return %arg0, %c0_i32, %c0_i32_0 : i32, i32, i32
  }
}

</mosaic_0001>

<bundles_post_ra>
// kernel: cross_entropy_loss.1
= control target key start
LH: loop header
LB: loop body
LE: loop exit
PB: predicated region body
PF: predicated region fallthrough
CT: control target
= control target key end

     0   :  { %s574_s12 = smov 0   ;;  %s576_s13 = smov 0   ;;  %s660_s0 = inlined_call_operand.vmem [shape: f32[2,4,256], index: 0, kind: input, shape index: {}]   ;;  %s661_s1 = inlined_call_operand.vmem [shape: s32[2,1,256], index: 1, kind: input, shape index: {}]   ;;  %s662_s2 = inlined_call_operand.vmem [shape: f32[2,1,256], index: 2, kind: output, shape index: {0}]   ;;  %s663_s3 = inlined_call_operand.vmem [shape: f32[2,1,256], index: 3, kind: output, shape index: {1}]  }
   0x1   :  { %s578_s14 = smov 0  }
   0x2 LB: > { %s26_s15 = sadd.s32 1, %s546_s13  ;;  %p487_p0 = scmp.ge.s32.totalorder %s550_s14, 1  ;;  %s550_s14 = sphi %s578_s14, %s14_s14   ;;  %s546_s13 = sphi %s576_s13, %s669_s13   ;;  %s542_s12 = sphi %s574_s12, %s668_s12  }
   0x3   : > { %p28_p1 = scmp.ge.s32.totalorder %s26_s15, 2  ;;  %p175_p2 = scmp.lt.s32.totalorder %s550_s14, 3 }
   0x5   : > { %s671_s15 = smov (%p28_p1, %s26_s15), 0  ;;  %p176_p3 = pnand %p487_p0, %p175_p2 }
   0x6   : > { %p215_p4 = scmp.lt.s32.totalorder (!%p176_p3), %s542_s12, 1 }
   0x7   : > { %179 = sbr.rel (%p176_p3) target bundleno = 93 (0x5d), region = 28 }
   0xc   : > { %s673_s12 = smov (!%p215_p4, %s542_s12), 1  ;;  %vm259_vm0 = vcmask 1043456   ;;  %v245_v19 = vlaneseq  ;;  %v552_v23 = vmov 0.0   ;;  %vm347_vm2 = vcmask 1040384  }
   0xd   : > { %s495_s16 = sshll.u32 %s673_s12, 3  ;;  %s490_s20 = sshll.u32 %s673_s12, 1  ;;  %v553_v26 = vmov 1  }
   0xe   : > { %s222_s19 = scalar_lea.vmem %s660_s0, %s495_s16  ;;  %s607_s23 = scalar_lea.vmem %s662_s2, %s490_s20  ;;  %vm614_vm1 = vcmp.lt.s32.totalorder %v245_v19, 256  ;;  %v346_v27 = vrot.slane %v553_v26, 7  ;;  %v309_v37 = vshrl.u32 %v245_v19, 7 }
   0xf   : > { %v251_v0 = vld [vmem:[%s222_s19] sm:$0xff]  ;;  %s612_s26 = scalar_lea.vmem %s663_s3, %s490_s20  ;;  %249 = vst.msk [vmem:[%s607_s23] sm:$0x3] %vm614_vm1, %v552_v23  ;;  %s231_s29 = scalar_lea.vmem %s661_s1, %s490_s20 }
  0x10   : > { %254 = vst [vmem:[#allocation1] ss:$2 sm:$0xff] %v251_v0  ;;  %v252_v25 = vld [vmem:[%s231_s29] sm:$0x3]  ;;  %v348_v28 = vsel %vm347_vm2, 1, %v346_v27 }
  0x11   : > { %250 = vst.msk [vmem:[%s612_s26] sm:$0x3] %vm614_vm1, %v552_v23  ;;  %vm343_vm3 = vcmp.ne.s32.totalorder %v252_v25, 4294967295  ;;  %vm349_vm4 = vcmp.ne.s32.totalorder %v348_v28, 0  ;;  %v310_v40 = vperm.slane %v252_v25, 0  ;;  %v311_v41 = vperm.slane %v252_v25, 1 }
  0x12   : > { %vm628_vm5 = vmand %vm343_vm3, %vm349_vm4 }
  0x13   : > { %v367_v30 = vsel %vm628_vm5, 1.0, %v552_v23  ;;  %vm312_vm6 = vcmp.eq.s32.totalorder %v309_v37, %v310_v40  ;;  %vm313_vm7 = vcmp.eq.s32.totalorder %v309_v37, %v311_v41 }
  0x17   : > { %v255_v1 = vld.sshfl [vmem:[#allocation1] sm:$0xff pattern:$0x75316420]  ;;  %v256_v2 = vld.sshfl [vmem:[#allocation1 + $0x8] sm:$0xff pattern:$0x75316420] }
  0x18   : > { %v260_v3 = vsel %vm259_vm0, %v255_v1, -inf  ;;  %v267_v4 = vsel %vm259_vm0, %v256_v2, -inf  ;;  %v366_v31 = vld [vmem:[%s612_s26] sm:$0x3] }
  0x19   : > { %v261_v5 = vrot.slane %v260_v3, 4  ;;  %v268_v6 = vrot.slane %v267_v4, 4  ;;  %v368_v34 = vadd.f32 %v367_v30, %v366_v31 }
  0x1b   : > { %v262_v7 = vmax.f32 %v260_v3, %v261_v5  ;;  %v269_v8 = vmax.f32 %v267_v4, %v268_v6  ;;  %369 = vst.msk [vmem:[%s612_s26] sm:$0x3] %vm614_vm1, %v368_v34 }
  0x1d   : > { %v263_v9 = vrot.slane %v262_v7, 2  ;;  %v270_v10 = vrot.slane %v269_v8, 2 }
  0x1f   : > { %v264_v11 = vmax.f32 %v262_v7, %v263_v9  ;;  %v271_v12 = vmax.f32 %v269_v8, %v270_v10 }
  0x21   : > { %v265_v13 = vrot.slane %v264_v11, 1  ;;  %v272_v14 = vrot.slane %v271_v12, 1 }
  0x23   : > { %v597_v15 = vmax.f32 %v271_v12, %v272_v14  ;;  %v599_v16 = vmax.f32 %v264_v11, %v265_v13 }
  0x25   : > { %v276_v17 = vrot.slane %v597_v15, 4 }
  0x27   : > { %v277_v18 = vsel %vm259_vm0, %v599_v16, %v276_v17  ;;  %v353_v17 = vld [vmem:[%s607_s23] sm:$0x3] }
  0x28   : > { %v279_v20 = vsub.f32 %v251_v0, %v277_v18 }
  0x2a   : > { %v280_v22 = vmul.f32 1.442695, %v279_v20 }
  0x2c   : > { %522 = vpow2.f32 %v280_v22 }
  0x32   : > { %v523_v24 = vpop.eup %522 }
  0x33   : > { %283 = vst [vmem:[#allocation1] ss:$2 sm:$0xff] %v523_v24 }
  0x3a   : > { %v284_v32 = vld.sshfl [vmem:[#allocation1] sm:$0xff pattern:$0x75316420]  ;;  %v285_v33 = vld.sshfl [vmem:[#allocation1 + $0x8] sm:$0xff pattern:$0x75316420] }
  0x3b   : > { %v288_v35 = vsel %vm259_vm0, %v284_v32, 0.0  ;;  %v295_v36 = vsel %vm259_vm0, %v285_v33, 0.0  ;;  %314 = vst [vmem:[#allocation1] ss:$2 sm:$0xff] %v251_v0 }
  0x3c   : > { %v289_v38 = vrot.slane %v288_v35, 4  ;;  %v296_v39 = vrot.slane %v295_v36, 4 }
  0x3e   : > { %v290_v42 = vadd.f32 %v289_v38, %v288_v35  ;;  %v297_v43 = vadd.f32 %v296_v39, %v295_v36 }
  0x40   : > { %v291_v44 = vrot.slane %v290_v42, 2  ;;  %v298_v45 = vrot.slane %v297_v43, 2 }
  0x42   : > { %v292_v46 = vadd.f32 %v291_v44, %v290_v42  ;;  %v299_v47 = vadd.f32 %v298_v45, %v297_v43  ;;  %v315_v48 = vld.sshfl [vmem:[#allocation1] sm:$0xff pattern:$0x75316420]  ;;  %v316_v49 = vld.sshfl [vmem:[#allocation1 + $0x8] sm:$0xff pattern:$0x75316420] }
  0x43   : > { %v319_v50 = vsel %vm312_vm6, %v315_v48, 0.0  ;;  %v320_v51 = vsel %vm313_vm7, %v316_v49, 0.0 }
  0x44   : > { %v293_v52 = vrot.slane %v292_v46, 1  ;;  %v300_v53 = vrot.slane %v299_v47, 1  ;;  %v321_v54 = vsel %vm259_vm0, %v319_v50, 0.0  ;;  %v328_v55 = vsel %vm259_vm0, %v320_v51, 0.0 }
  0x45   : > { %v322_v56 = vrot.slane %v321_v54, 4  ;;  %v329_v57 = vrot.slane %v328_v55, 4 }
  0x46   : > { %v294_v58 = vadd.f32 %v293_v52, %v292_v46  ;;  %v301_v59 = vadd.f32 %v300_v53, %v299_v47 }
  0x47   : > { %v323_v60 = vadd.f32 %v322_v56, %v321_v54  ;;  %v330_v61 = vadd.f32 %v329_v57, %v328_v55 }
  0x48   : > { %524 = vlog2.f32 %v294_v58 }
  0x49   : > { %526 = vlog2.f32 %v301_v59  ;;  %v324_v62 = vrot.slane %v323_v60, 2  ;;  %v331_v63 = vrot.slane %v330_v61, 2 }
  0x4b   : > { %v332_v0 = vadd.f32 %v331_v63, %v330_v61  ;;  %v325_v1 = vadd.f32 %v324_v62, %v323_v60 }
  0x4d   : > { %v333_v3 = vrot.slane %v332_v0, 1  ;;  %v326_v7 = vrot.slane %v325_v1, 1 }
  0x4e   : > { %v525_v2 = vpop.eup %524 }
  0x4f   : > { %v527_v4 = vpop.eup %526  ;;  %v303_v5 = vmul.f32 0.6931472, %v525_v2  ;;  %v334_v10 = vadd.f32 %v333_v3, %v332_v0  ;;  %v327_v11 = vadd.f32 %v326_v7, %v325_v1 }
  0x50   : > { %v305_v6 = vmul.f32 0.6931472, %v527_v4 }
  0x51   : > { %v306_v8 = vadd.f32 %v303_v5, %v599_v16 }
  0x52   : > { %v307_v9 = vadd.f32 %v305_v6, %v597_v15 }
  0x53   : > { %v351_v13 = vsub.f32 %v306_v8, %v327_v11 }
  0x54   : > { %v352_v12 = vsub.f32 %v307_v9, %v334_v10 }
  0x56   : > { %v356_v14 = vrot.slane %v352_v12, 7 }
  0x58   : > { %v357_v18 = vsel %vm347_vm2, %v351_v13, %v356_v14 }
  0x59   : > { %v359_v19 = vsel %vm628_vm5, %v357_v18, 0.0 }
  0x5a   : > { %v360_v20 = vadd.f32 %v359_v19, %v353_v17 }
  0x5c   : > { %365 = vst.msk [vmem:[%s607_s23] sm:$0x3] %vm614_vm1, %v360_v20 }
  0x5d PF: > { %s14_s14 = sadd.s32 1, %s550_s14   ;;  %s668_s12 = smov %s546_s13 }
  0x5e   : > { %p11_p5 = scmp.ge.s32.totalorder %s14_s14, 4   ;;  %s669_s13 = smov %s671_s15 }
  0x60   :  { %13 = sbr.rel (!%p11_p5) target bundleno = 2 (0x2), region = 77 }

</bundles_post_ra>
